<compile_context>
chip_gen: v5e
topology: v5e:2x2
jax: 0.10.0
libtpu: 0.0.40
codegen_flags: <defaults>
</compile_context>

<pallas_src>
import jax
import jax.numpy as jnp
from jax.experimental import pallas as pl
from jax.experimental.pallas import tpu as pltpu

BN_EPS = 1e-5
LEAKY_SLOPE = 0.2


def _round_up(n, m):
    return (n + m - 1) // m * m


def _encoder_kernel(x_ref, eps_ref, w1_ref, b1_ref, wh_ref, bh_ref, out_ref):
    # Linear (eval-mode BN pre-folded into w1/b1) + LeakyReLU(0.2)
    h = jnp.dot(x_ref[...], w1_ref[...], preferred_element_type=jnp.float32)
    h = h + b1_ref[...]
    h = jnp.where(h >= 0, h, LEAKY_SLOPE * h)

    # Fused mu|logvar head: one matmul into (TM, 2Z)
    heads = jnp.dot(h, wh_ref[...], preferred_element_type=jnp.float32)
    heads = heads + bh_ref[...]
    z_dim = bh_ref.shape[-1] // 2
    mu = heads[:, :z_dim]
    lv = jnp.clip(heads[:, z_dim:], -5.0, 5.0)        # Hardtanh(-5, 5)

    # Reparameterization sample
    z = mu + jnp.exp(0.5 * lv) * eps_ref[...]

    # Single packed store: [z | mu | logvar]
    out_ref[...] = jnp.concatenate([z, mu, lv], axis=-1)


def spectral_encoder_forward(x, eps, params, *, n_grains, l_grain,
                             max_row_tile=512):
    """x: (B, n_grains, l_grain//2+1) float32.  eps: (B*n_grains, z_dim)."""
    B = x.shape[0]
    F = l_grain // 2 + 1
    N = B * n_grains
    H = params["w1"].shape[1]
    Z = params["wmu"].shape[1]

    # ---- host-side constant precompute (pure wrapper-side folding) ----
    # Fold eval-mode BatchNorm1d into the first Linear.
    scale = params["gamma"] * jax.lax.rsqrt(params["rvar"] + BN_EPS)   # (1, H)
    w1 = params["w1"] * scale                                          # (F, H)
    b1 = (params["b1"] - params["rmean"]) * scale + params["beta"]     # (1, H)
    # Fuse mu / logvar heads into one matmul.
    wh = jnp.concatenate([params["wmu"], params["wlv"]], axis=1)       # (H, 2Z)
    bh = jnp.concatenate([params["bmu"], params["blv"]], axis=1)       # (1, 2Z)

    # Pad K (feature) dim to a multiple of 128 for aligned MXU passes.
    Fp = _round_up(F, 128)
    # Large row tile; pad N so the grid divides evenly.
    row_tile = min(max_row_tile, _round_up(N, 8))
    Np = _round_up(N, row_tile)

    mb = x.reshape(N, F)
    mb = jnp.pad(mb, ((0, Np - N), (0, Fp - F)))
    eps_p = jnp.pad(eps, ((0, Np - N), (0, 0)))
    w1 = jnp.pad(w1, ((0, Fp - F), (0, 0)))

    full = lambda shape: pl.BlockSpec(shape, lambda i: (0, 0))
    row = lambda cols: pl.BlockSpec((row_tile, cols), lambda i: (i, 0))

    # Raise scoped-VMEM limit only if the tiles actually need it (keeps
    # headroom on v7x's 64 MiB VMEM).
    tile_bytes = (2 * row_tile * (Fp + Z + 3 * Z) * 4            # dbl-buffered row tiles
                  + 2 * (Fp * H + H + H * 2 * Z + 2 * Z) * 4)    # weights/biases
    compiler_kwargs = dict(dimension_semantics=("parallel",))
    if tile_bytes > 12 * 1024 * 1024:
        compiler_kwargs["vmem_limit_bytes"] = min(int(2 * tile_bytes),
                                                  48 * 1024 * 1024)

    packed = pl.pallas_call(
        _encoder_kernel,
        out_shape=jax.ShapeDtypeStruct((Np, 3 * Z), jnp.float32),
        grid_spec=pltpu.PrefetchScalarGridSpec(
            num_scalar_prefetch=0,
            grid=(Np // row_tile,),
            in_specs=[
                row(Fp),             # x tile
                row(Z),              # eps tile
                full((Fp, H)),       # folded w1
                full((1, H)),        # folded b1
                full((H, 2 * Z)),    # fused head weights
                full((1, 2 * Z)),    # fused head biases
            ],
            out_specs=row(3 * Z),
        ),
        compiler_params=pltpu.CompilerParams(**compiler_kwargs),
    )(mb, eps_p, w1, b1, wh, bh)

    z = packed[:N, :Z]
    mu = packed[:N, Z:2 * Z]
    lv = packed[:N, 2 * Z:]
    return z, mu, lv


def _reference_forward(x, eps, params, *, n_grains, l_grain):
    """Pure-JAX reference mirroring the PyTorch module (un-folded math)."""
    B = x.shape[0]
    F = l_grain // 2 + 1
    mb = x.reshape(B * n_grains, F)
    h = mb @ params["w1"] + params["b1"]
    h = (h - params["rmean"]) / jnp.sqrt(params["rvar"] + BN_EPS)
    h = h * params["gamma"] + params["beta"]
    h = jnp.where(h >= 0, h, LEAKY_SLOPE * h)
    mu = h @ params["wmu"] + params["bmu"]
    lv = jnp.clip(h @ params["wlv"] + params["blv"], -5.0, 5.0)
    z = mu + jnp.exp(0.5 * lv) * eps
    return z, mu, lv


def init_params(key, flatten_size, h_dim, z_dim):
    """Deterministic synthetic parameter init (uniform +-1/sqrt(fan_in))."""
    ks = jax.random.split(key, 10)
    u = lambda k, shape, fan: jax.random.uniform(
        k, shape, jnp.float32, -1.0 / jnp.sqrt(fan), 1.0 / jnp.sqrt(fan))
    return {
        "w1":    u(ks[0], (flatten_size, h_dim), flatten_size),
        "b1":    u(ks[1], (1, h_dim), flatten_size),
        "gamma": 1.0 + 0.1 * jax.random.normal(ks[2], (1, h_dim), jnp.float32),
        "beta":  0.1 * jax.random.normal(ks[3], (1, h_dim), jnp.float32),
        "rmean": 0.1 * jax.random.normal(ks[4], (1, h_dim), jnp.float32),
        "rvar":  0.5 + jnp.abs(jax.random.normal(ks[5], (1, h_dim), jnp.float32)),
        "wmu":   u(ks[6], (h_dim, z_dim), h_dim),
        "bmu":   u(ks[7], (1, z_dim), h_dim),
        "wlv":   u(ks[8], (h_dim, z_dim), h_dim),
        "blv":   u(ks[9], (1, z_dim), h_dim),
    }


if __name__ == "__main__":
    # Small shapes consistent with the module: l_grain=256 -> flatten=129.
    B, n_grains, l_grain = 2, 8, 256
    h_dim, z_dim = 32, 16
    F = l_grain // 2 + 1
    N = B * n_grains

    key = jax.random.PRNGKey(0)
    kx, keps, kp = jax.random.split(key, 3)
    x = jax.random.normal(kx, (B, n_grains, F), jnp.float32)
    eps = jax.random.normal(keps, (N, z_dim), jnp.float32)
    params = init_params(kp, F, h_dim, z_dim)

    z, mu, lv = spectral_encoder_forward(
        x, eps, params, n_grains=n_grains, l_grain=l_grain)
    jax.block_until_ready((z, mu, lv))

    z_ref, mu_ref, lv_ref = _reference_forward(
        x, eps, params, n_grains=n_grains, l_grain=l_grain)
    assert jnp.allclose(mu, mu_ref, atol=1e-4, rtol=1e-4)
    assert jnp.allclose(lv, lv_ref, atol=1e-4, rtol=1e-4)
    assert jnp.allclose(z, z_ref, atol=1e-4, rtol=1e-4)

    print("KERNEL_OK")
</pallas_src>

<mosaic_0001>
module attributes {stable_mosaic.version = 11 : i64} {
  func.func @_encoder_kernel(%arg0: i32, %arg1: memref<16x256xf32, #tpu.memory_space<vmem>>, %arg2: memref<16x16xf32, #tpu.memory_space<vmem>>, %arg3: memref<256x32xf32, #tpu.memory_space<vmem>>, %arg4: memref<1x32xf32, #tpu.memory_space<vmem>>, %arg5: memref<32x32xf32, #tpu.memory_space<vmem>>, %arg6: memref<1x32xf32, #tpu.memory_space<vmem>>, %arg7: memref<16x48xf32, #tpu.memory_space<vmem>>) attributes {dimension_semantics = [#tpu.dimension_semantics<parallel>], iteration_bounds = array<i64: 1>, scalar_prefetch = 0 : i64, scratch_operands = 0 : i64, tpu.core_type = #tpu.core_type<tc>, window_params = [{transform_indices = @transform_0, window_bounds = array<i64: 16, 256>}, {transform_indices = @transform_1, window_bounds = array<i64: 16, 16>}, {pipeline_mode = #tpu.pipeline_mode<synchronous>, transform_indices = @transform_2, window_bounds = array<i64: 256, 32>}, {pipeline_mode = #tpu.pipeline_mode<synchronous>, transform_indices = @transform_3, window_bounds = array<i64: 1, 32>}, {pipeline_mode = #tpu.pipeline_mode<synchronous>, transform_indices = @transform_4, window_bounds = array<i64: 32, 32>}, {pipeline_mode = #tpu.pipeline_mode<synchronous>, transform_indices = @transform_5, window_bounds = array<i64: 1, 32>}, {transform_indices = @transform_6, window_bounds = array<i64: 16, 48>}]} {
    %c0 = arith.constant 0 : index
    %c0_0 = arith.constant 0 : index
    %0 = vector.load %arg1[%c0, %c0_0] : memref<16x256xf32, #tpu.memory_space<vmem>>, vector<16x256xf32>
    %c0_1 = arith.constant 0 : index
    %c0_2 = arith.constant 0 : index
    %1 = vector.load %arg3[%c0_1, %c0_2] : memref<256x32xf32, #tpu.memory_space<vmem>>, vector<256x32xf32>
    %cst = arith.constant dense<0.000000e+00> : vector<16x32xf32>
    %2 = tpu.matmul %0, %1, %cst {dimension_numbers = #tpu.dot_dimension_numbers<[1], [0], [0], [1], [0, 0, 1, 1], [], []>} : vector<16x256xf32>, vector<256x32xf32>, vector<16x32xf32> -> vector<16x32xf32>
    %c0_3 = arith.constant 0 : index
    %c0_4 = arith.constant 0 : index
    %3 = vector.load %arg4[%c0_3, %c0_4] : memref<1x32xf32, #tpu.memory_space<vmem>>, vector<1x32xf32>
    %4 = vector.broadcast %3 : vector<1x32xf32> to vector<16x32xf32>
    %5 = arith.addf %2, %4 : vector<16x32xf32>
    %cst_5 = arith.constant 0.000000e+00 : f32
    %6 = vector.broadcast %cst_5 : f32 to vector<16x32xf32>
    %7 = arith.cmpf oge, %5, %6 : vector<16x32xf32>
    %cst_6 = arith.constant 2.000000e-01 : f32
    %8 = vector.broadcast %cst_6 : f32 to vector<16x32xf32>
    %9 = arith.mulf %8, %5 : vector<16x32xf32>
    %10 = arith.select %7, %5, %9 : vector<16x32xi1>, vector<16x32xf32>
    %c0_7 = arith.constant 0 : index
    %c0_8 = arith.constant 0 : index
    %11 = vector.load %arg5[%c0_7, %c0_8] : memref<32x32xf32, #tpu.memory_space<vmem>>, vector<32x32xf32>
    %cst_9 = arith.constant dense<0.000000e+00> : vector<16x32xf32>
    %12 = tpu.matmul %10, %11, %cst_9 {dimension_numbers = #tpu.dot_dimension_numbers<[1], [0], [0], [1], [0, 0, 1, 1], [], []>} : vector<16x32xf32>, vector<32x32xf32>, vector<16x32xf32> -> vector<16x32xf32>
    %c0_10 = arith.constant 0 : index
    %c0_11 = arith.constant 0 : index
    %13 = vector.load %arg6[%c0_10, %c0_11] : memref<1x32xf32, #tpu.memory_space<vmem>>, vector<1x32xf32>
    %14 = vector.broadcast %13 : vector<1x32xf32> to vector<16x32xf32>
    %15 = arith.addf %12, %14 : vector<16x32xf32>
    %16 = vector.extract_strided_slice %15 {offsets = [0, 0], sizes = [16, 16], strides = [1, 1]} : vector<16x32xf32> to vector<16x16xf32>
    %17 = vector.extract_strided_slice %15 {offsets = [0, 16], sizes = [16, 16], strides = [1, 1]} : vector<16x32xf32> to vector<16x16xf32>
    %cst_12 = arith.constant -5.000000e+00 : f32
    %cst_13 = arith.constant 5.000000e+00 : f32
    %18 = vector.broadcast %cst_12 : f32 to vector<16x16xf32>
    %19 = arith.maximumf %18, %17 : vector<16x16xf32>
    %20 = vector.broadcast %cst_13 : f32 to vector<16x16xf32>
    %21 = arith.minimumf %20, %19 : vector<16x16xf32>
    %cst_14 = arith.constant 5.000000e-01 : f32
    %22 = vector.broadcast %cst_14 : f32 to vector<16x16xf32>
    %23 = arith.mulf %22, %21 : vector<16x16xf32>
    %24 = math.exp %23 : vector<16x16xf32>
    %c0_15 = arith.constant 0 : index
    %c0_16 = arith.constant 0 : index
    %25 = vector.load %arg2[%c0_15, %c0_16] : memref<16x16xf32, #tpu.memory_space<vmem>>, vector<16x16xf32>
    %26 = arith.mulf %24, %25 : vector<16x16xf32>
    %27 = arith.addf %16, %26 : vector<16x16xf32>
    %28 = tpu.concatenate %27, %16, %21 in 1 : vector<16x16xf32>, vector<16x16xf32>, vector<16x16xf32> -> vector<16x48xf32>
    %c0_17 = arith.constant 0 : index
    %c0_18 = arith.constant 0 : index
    %29 = vector.load %arg7[%c0_17, %c0_18] : memref<16x48xf32, #tpu.memory_space<vmem>>, vector<16x48xf32>
    tpu.vector_store %arg7[%c0_17, %c0_18], %28 {strides = array<i32>} : memref<16x48xf32, #tpu.memory_space<vmem>>, vector<16x48xf32>,
    return
  }
  func.func @transform_0(%arg0: i32) -> (i32, i32) {
    %c0_i32 = arith.constant 0 : i32
    %c0_i32_0 = arith.constant 0 : i32
    return %arg0, %c0_i32 : i32, i32
  }
  func.func @transform_1(%arg0: i32) -> (i32, i32) {
    %c0_i32 = arith.constant 0 : i32
    %c0_i32_0 = arith.constant 0 : i32
    return %arg0, %c0_i32 : i32, i32
  }
  func.func @transform_2(%arg0: i32) -> (i32, i32) {
    %c0_i32 = arith.constant 0 : i32
    %c0_i32_0 = arith.constant 0 : i32
    %c0_i32_1 = arith.constant 0 : i32
    return %c0_i32, %c0_i32_0 : i32, i32
  }
  func.func @transform_3(%arg0: i32) -> (i32, i32) {
    %c0_i32 = arith.constant 0 : i32
    %c0_i32_0 = arith.constant 0 : i32
    %c0_i32_1 = arith.constant 0 : i32
    return %c0_i32, %c0_i32_0 : i32, i32
  }
  func.func @transform_4(%arg0: i32) -> (i32, i32) {
    %c0_i32 = arith.constant 0 : i32
    %c0_i32_0 = arith.constant 0 : i32
    %c0_i32_1 = arith.constant 0 : i32
    return %c0_i32, %c0_i32_0 : i32, i32
  }
  func.func @transform_5(%arg0: i32) -> (i32, i32) {
    %c0_i32 = arith.constant 0 : i32
    %c0_i32_0 = arith.constant 0 : i32
    %c0_i32_1 = arith.constant 0 : i32
    return %c0_i32, %c0_i32_0 : i32, i32
  }
  func.func @transform_6(%arg0: i32) -> (i32, i32) {
    %c0_i32 = arith.constant 0 : i32
    %c0_i32_0 = arith.constant 0 : i32
    return %arg0, %c0_i32 : i32, i32
  }
}

</mosaic_0001>

<bundles_post_ra>
// kernel: tpu_custom_call.1
= control target key start
LH: loop header
LB: loop body
LE: loop exit
PB: predicated region body
PF: predicated region fallthrough
CT: control target
= control target key end

     0   :  { %s474_s0 = inlined_call_operand.vmem [shape: f32[16,256], index: 0, kind: input, shape index: {}]   ;;  %s475_s1 = inlined_call_operand.vmem [shape: f32[16,16], index: 1, kind: input, shape index: {}]   ;;  %s476_s2 = inlined_call_operand.vmem [shape: f32[256,32], index: 2, kind: input, shape index: {}]   ;;  %s477_s3 = inlined_call_operand.vmem [shape: f32[1,32], index: 3, kind: input, shape index: {}]   ;;  %s478_s4 = inlined_call_operand.vmem [shape: f32[32,32], index: 4, kind: input, shape index: {}]   ;;  %s479_s5 = inlined_call_operand.vmem [shape: f32[1,32], index: 5, kind: input, shape index: {}]   ;;  %s480_s6 = inlined_call_operand.hbm [shape: f32[16,48], index: 6, kind: output, shape index: {}]  }
   0x1   :  { %v43_v0 = vld [vmem:[%s476_s2 + $0x78] sm:$0xff]  ;;  %v42_v2 = vld [vmem:[%s476_s2 + $0x70] sm:$0xff]  ;;  %v41_v4 = vld [vmem:[%s476_s2 + $0x68] sm:$0xff] }
   0x2   :  { %v59_v1 = vld [vmem:[%s476_s2 + $0xf8] sm:$0xff]  ;;  %64 = vmatpush.msra.mxu0 %v43_v0  ;;  %232 = vmatpush.msra.mxu3 %v43_v0  ;;  %v58_v3 = vld [vmem:[%s476_s2 + $0xf0] sm:$0xff]  ;;  %v57_v5 = vld [vmem:[%s476_s2 + $0xe8] sm:$0xff] }
   0x3   :  { %87 = vmatpush.msra.mxu1 %v59_v1  ;;  %v40_v6 = vld [vmem:[%s476_s2 + $0x60] sm:$0xff]  ;;  %v39_v8 = vld [vmem:[%s476_s2 + $0x58] sm:$0xff]  ;;  %v38_v10 = vld [vmem:[%s476_s2 + $0x50] sm:$0xff] }
   0x4   :  { %65 = vmatpush.msra.mxu0 %v42_v2  ;;  %233 = vmatpush.msra.mxu3 %v42_v2  ;;  %v56_v7 = vld [vmem:[%s476_s2 + $0xe0] sm:$0xff]  ;;  %v55_v9 = vld [vmem:[%s476_s2 + $0xd8] sm:$0xff]  ;;  %v54_v11 = vld [vmem:[%s476_s2 + $0xd0] sm:$0xff] }
   0x5   :  { %88 = vmatpush.msra.mxu1 %v58_v3  ;;  %v37_v12 = vld [vmem:[%s476_s2 + $0x48] sm:$0xff]  ;;  %v36_v14 = vld [vmem:[%s476_s2 + $0x40] sm:$0xff] }
   0x6   :  { %66 = vmatpush.msra.mxu0 %v41_v4  ;;  %234 = vmatpush.msra.mxu3 %v41_v4  ;;  %v53_v13 = vld [vmem:[%s476_s2 + $0xc8] sm:$0xff]  ;;  %v52_v15 = vld [vmem:[%s476_s2 + $0xc0] sm:$0xff] }
   0x7   :  { %89 = vmatpush.msra.mxu1 %v57_v5 }
   0x8   :  { %67 = vmatpush.msra.mxu0 %v40_v6  ;;  %235 = vmatpush.msra.mxu3 %v40_v6 }
   0x9   :  { %90 = vmatpush.msra.mxu1 %v56_v7 }
   0xa   :  { %68 = vmatpush.msra.mxu0 %v39_v8  ;;  %236 = vmatpush.msra.mxu3 %v39_v8 }
   0xb   :  { %91 = vmatpush.msra.mxu1 %v55_v9 }
   0xc   :  { %69 = vmatpush.msra.mxu0 %v38_v10  ;;  %237 = vmatpush.msra.mxu3 %v38_v10 }
   0xd   :  { %92 = vmatpush.msra.mxu1 %v54_v11 }
   0xe   :  { %70 = vmatpush.msra.mxu0 %v37_v12  ;;  %238 = vmatpush.msra.mxu3 %v37_v12 }
   0xf   :  { %11 = vsyncpa [#allocation3], 0  ;;  %93 = vmatpush.msra.mxu1 %v53_v13  ;;  %v35_v16 = vld [vmem:[%s476_s2 + $0x38] sm:$0xff]  ;;  %v34_v18 = vld [vmem:[%s476_s2 + $0x30] sm:$0xff]  ;;  %s285_s29 = smov 16   ;;  %vm124_vm1 = vcmask 261120  }
  0x10   :  { %71 = vmatpush.msra.mxu0 %v36_v14  ;;  %239 = vmatpush.msra.mxu3 %v36_v14  ;;  %v51_v17 = vld [vmem:[%s476_s2 + $0xb8] sm:$0xff]  ;;  %v50_v19 = vld [vmem:[%s476_s2 + $0xb0] sm:$0xff]  ;;  %v33_v20 = vld [vmem:[%s476_s2 + $0x28] sm:$0xff]  ;;  %vm202_vm3 = vcmask 130048   ;;  %vm207_vm4 = vcmask 392192   ;;  %s216_s13 = sshll.u32 %s480_s6, 4  ;;  %s217_s13 = int_to_ptr.hbm [resolvable:$true] %s216_s13 }
  0x11   :  { %94 = vmatpush.msra.mxu1 %v52_v15  ;;  %v49_v21 = vld [vmem:[%s476_s2 + $0xa8] sm:$0xff]  ;;  %v32_v22 = vld [vmem:[%s476_s2 + $0x20] sm:$0xff]  ;;  %v31_v24 = vld [vmem:[%s476_s2 + $0x18] sm:$0xff]  ;;  %s288_s14 = smov 128   ;;  %s289_s15 = smov 8  }
  0x12   :  { %72 = vmatpush.msra.mxu0 %v35_v16  ;;  %240 = vmatpush.msra.mxu3 %v35_v16  ;;  %v48_v23 = vld [vmem:[%s476_s2 + $0xa0] sm:$0xff]  ;;  %v47_v25 = vld [vmem:[%s476_s2 + $0x98] sm:$0xff]  ;;  %v30_v26 = vld [vmem:[%s476_s2 + $0x10] sm:$0xff] }
  0x13   :  { %95 = vmatpush.msra.mxu1 %v51_v17  ;;  %v46_v27 = vld [vmem:[%s476_s2 + $0x90] sm:$0xff]  ;;  %v29_v28 = vld [vmem:[%s476_s2 + $0x8] sm:$0xff]  ;;  %v28_v30 = vld [vmem:[%s476_s2] sm:$0xff] }
  0x14   :  { %73 = vmatpush.msra.mxu0 %v34_v18  ;;  %241 = vmatpush.msra.mxu3 %v34_v18  ;;  %v45_v29 = vld [vmem:[%s476_s2 + $0x88] sm:$0xff]  ;;  %v44_v31 = vld [vmem:[%s476_s2 + $0x80] sm:$0xff]  ;;  %v26_v33 = vld [vmem:[%s474_s0 + $0x10] sm:$0xff] }
  0x15   :  { %96 = vmatpush.msra.mxu1 %v50_v19  ;;  %v24_v32 = vld [vmem:[%s474_s0] sm:$0xff]  ;;  %v25_v34 = vld [vmem:[%s474_s0 + $0x8] sm:$0xff]  ;;  %v27_v35 = vld [vmem:[%s474_s0 + $0x18] sm:$0xff] }
  0x16   :  { %74 = vmatpush.msra.mxu0 %v33_v20  ;;  %242 = vmatpush.msra.mxu3 %v33_v20  ;;  %v119_v36 = vld [vmem:[%s478_s4 + $0x18] sm:$0xff]  ;;  %v118_v37 = vld [vmem:[%s478_s4 + $0x10] sm:$0xff]  ;;  %v117_v38 = vld [vmem:[%s478_s4 + $0x8] sm:$0xff] }
  0x17   :  { %97 = vmatpush.msra.mxu1 %v49_v21  ;;  %143 = vmatpush.msra.mxu2 %v119_v36  ;;  %v116_v39 = vld [vmem:[%s478_s4] sm:$0xff]  ;;  %v165_v41 = vld [vmem:[%s475_s1 + $0x8] sm:$0xff]  ;;  %s286_s4 = smov 112  }
  0x18   :  { %75 = vmatpush.msra.mxu0 %v32_v22  ;;  %243 = vmatpush.msra.mxu3 %v32_v22  ;;  %v164_v40 = vld [vmem:[%s475_s1] sm:$0xff] }
  0x19   :  { %98 = vmatpush.msra.mxu1 %v48_v23  ;;  %144 = vmatpush.msra.mxu2 %v118_v37  ;;  %v253_v42 = vld [vmem:[%s477_s3] ss:$0 sm:$0xff] }
  0x1a   :  { %76 = vmatpush.msra.mxu0 %v31_v24  ;;  %244 = vmatpush.msra.mxu3 %v31_v24  ;;  %v254_v55 = vld [vmem:[%s479_s5] ss:$0 sm:$0xff]  ;;  %s287_s5 = smov [#allocation2]  }
  0x1b   :  { %99 = vmatpush.msra.mxu1 %v47_v25  ;;  %145 = vmatpush.msra.mxu2 %v117_v38  ;;  %s214_s10 = sshll.u32 %s287_s5, 4  ;;  %s215_s10 = int_to_ptr.vmem [resolvable:$true] %s214_s10 }
  0x1c   :  { %77 = vmatpush.msra.mxu0 %v30_v26  ;;  %245 = vmatpush.msra.mxu3 %v30_v26 }
  0x1d   :  { %100 = vmatpush.msra.mxu1 %v46_v27  ;;  %146 = vmatpush.msra.mxu2 %v116_v39 }
  0x1e   :  { %78 = vmatpush.msra.mxu0 %v29_v28  ;;  %246 = vmatpush.msra.mxu3 %v29_v28 }
  0x1f   :  { %101 = vmatpush.msra.mxu1 %v45_v29  ;;  %168 = vrot.lane.b32.xlu0 %v164_v40, %s285_s29 }
  0x20   :  { %79 = vmatpush.msra.mxu0 %v28_v30  ;;  %247 = vmatpush.msra.mxu3 %v28_v30 }
  0x21   :  { %102 = vmatpush.msra.mxu1 %v44_v31  ;;  %80 = vmatmul.f32.vlgmr.msra.gmra.mxu0 %v24_v32 }
  0x22   :  { %83 = vmatmul.f32.vlgmr.msra.gmra.mxu3 %v26_v33  ;;  %103 = vmatmul.f32.vlgmr.msra.gmra.mxu1 %v25_v34 }
  0x27   :  { %170 = vrot.lane.b32.xlu0 %v165_v41, %s285_s29 }
  0x2a   :  { %106 = vmatmul.f32.gmra.mxu1 %v27_v35 }
  0x91   :  { %v169_v0 = vpop.permute.xlu0 %168 }
  0x99   :  { %v171_v5 = vpop.permute.xlu0 %170 }
  0x9e   :  { %v81_v43 = vpop.f32.mrf.mxu0 }
  0x9f   :  { %v82_v44 = vadd.f32 %v253_v42, %v81_v43  ;;  %v104_v45 = vpop.f32.mrf.mxu1 }
  0xa1   :  { %v105_v46 = vadd.f32 %v104_v45, %v82_v44 }
  0xa3   :  { %v112_v47 = vmul.f32 0.2, %v105_v46  ;;  %vm110_vm0 = vcmp.ge.f32.partialorder %v105_v46, 0.0 }
  0xa5   :  { %v84_v48 = vpop.f32.mrf.mxu3  ;;  %v114_v49 = vsel %vm110_vm0, %v105_v46, %v112_v47 }
  0xa6   :  { %v85_v50 = vadd.f32 %v253_v42, %v84_v48  ;;  %228 = vmatmul.msk.f32.vlgmr.msra.gmra.mxu2 %vm124_vm1, %v114_v49 }
  0xa7   :  { %v107_v51 = vpop.f32.mrf.mxu1 }
  0xa8   :  { %v108_v52 = vadd.f32 %v107_v51, %v85_v50 }
  0xaa   :  { %v113_v53 = vmul.f32 0.2, %v108_v52  ;;  %vm111_vm2 = vcmp.ge.f32.partialorder %v108_v52, 0.0 }
  0xac   :  { %v115_v54 = vsel %vm111_vm2, %v108_v52, %v113_v53 }
  0xae   :  { %229 = vmatmul.msk.f32.gmra.mxu2 %vm124_vm1, %v115_v54 }
 0x129   :  { %v148_v56 = vpop.f32.mrf.mxu2 }
 0x12a   :  { %v149_v57 = vadd.f32 %v254_v55, %v148_v56 }
 0x12c   :  { %188 = vrot.lane.b32.xlu2 %v149_v57, %s285_s29  ;;  %v230_v58 = vclamps-f32 %v149_v57, 5.0 }
 0x12e   :  { %196 = vrot.lane.b32.xlu0 %v230_v58, %s285_s29  ;;  %v158_v59 = vmul.f32 0.5, %v230_v58 }
 0x130   :  { %v160_v60 = vmul.f32 1.442695, %v158_v59 }
 0x131   :  { %v151_v61 = vpop.f32.mrf.mxu2 }
 0x132   :  { %255 = vpow2.f32 %v160_v60  ;;  %v152_v62 = vadd.f32 %v254_v55, %v151_v61 }
 0x134   :  { %v231_v63 = vclamps-f32 %v152_v62, 5.0  ;;  %190 = vrot.lane.b32.xlu2 %v152_v62, %s285_s29 }
 0x136   :  { %v159_v1 = vmul.f32 0.5, %v231_v63 }
 0x138   :  { %v256_v2 = vpop.eup %255  ;;  %v162_v3 = vmul.f32 1.442695, %v159_v1 }
 0x139   :  { %v174_v4 = vmul.f32 %v256_v2, %v169_v0 }
 0x13a   :  { %257 = vpow2.f32 %v162_v3 }
 0x13b   :  { %178 = vrot.lane.b32.xlu1 %v174_v4, %s286_s4 }
 0x140   :  { %v258_v6 = vpop.eup %257 }
 0x141   :  { %v175_v7 = vmul.f32 %v258_v6, %v171_v5 }
 0x143   :  { %180 = vrot.lane.b32.xlu1 %v175_v7, %s286_s4 }
 0x14b   :  { %198 = vrot.lane.b32.xlu1 %v231_v63, %s285_s29 }
 0x186   :  { %v189_v10 = vpop.permute.xlu2 %188 }
 0x18e   :  { %v191_v16 = vpop.permute.xlu2 %190 }
 0x1a0   :  { %v197_v11 = vpop.permute.xlu0 %196 }
 0x1ad   :  { %v179_v8 = vpop.permute.xlu1 %178 }
 0x1ae   :  { %v184_v9 = vadd.f32 %v179_v8, %v149_v57 }
 0x1b0   :  { %v203_v12 = vsel %vm202_vm3, %v184_v9, %v189_v10 }
 0x1b1   :  { %v205_v13 = vsel %vm124_vm1, %v203_v12, %v197_v11 }
 0x1b2   :  { %208 = vst.msk [vmem:[#allocation2] sm:$0xff] %vm207_vm4, %v205_v13 }
 0x1b5   :  { %v181_v14 = vpop.permute.xlu1 %180 }
 0x1b6   :  { %v185_v15 = vadd.f32 %v181_v14, %v152_v62 }
 0x1b8   :  { %v204_v17 = vsel %vm202_vm3, %v185_v15, %v191_v16 }
 0x1bd   :  { %v199_v18 = vpop.permute.xlu1 %198 }
 0x1be   :  { %v206_v19 = vsel %vm124_vm1, %v204_v17, %v199_v18 }
 0x1bf   :  { %209 = vst.msk [vmem:[#allocation2 + $0x8] sm:$0xff] %vm207_vm4, %v206_v19 }
 0x1c0   :  { %222 = dma.vmem_to_hbm [thread:$0]  %s215_s10, 256, %s217_s13, [#allocation3], %s288_s14, %s288_s14, %s289_s15  }
 0x1c1   :  { %283 = dma.done.wait [#allocation3], 256  }
 0x1c2   :  { %284 = vsyncadd [#allocation3], 4294967040 }
 0x1c3   :  { %227 = vsyncpa [#allocation3], 1 }

</bundles_post_ra>
